<compile_context>
chip_gen: v7x
topology: tpu7x:2x2x1
jax: 0.10.0
libtpu: 0.0.40
codegen_flags: <defaults>
</compile_context>

<pallas_src>
import functools

import jax
import jax.numpy as jnp
from jax.experimental import pallas as pl
from jax.experimental.pallas import tpu as pltpu


def _round_up(x, m):
    return ((x + m - 1) // m) * m


# ---------------------------------------------------------------------------
# Pallas kernel: full MLP forward on one batch tile (features x batch layout).
# ---------------------------------------------------------------------------
def beam_pinn_kernel(x_ref, p_ref, out_ref, *, num_layers, num_neurons,
                     num_input, num_output, row_stride, compute_dtype):
    N, RB, L = num_neurons, row_stride, num_layers
    H = L - 1
    cd = compute_dtype
    f32 = jnp.float32

    r_wout = RB * L            # W_out row block
    r_bias = RB * (L + 1)      # bias row block (biases stored as columns)

    x = x_ref[...]                                   # (num_input, Bt)
    bias_blk = p_ref[r_bias:r_bias + N, :]           # (N, C): col0=b_in, 1+l=b_hid[l], L=b_out

    # ---- input layer: Linear + Tanh ---------------------------------------
    # K == num_input is tiny (e.g. 2): VPU broadcast-MACs beat a padded MXU pass.
    w_in = p_ref[0:N, 0:num_input]                   # (N, num_input), PyTorch (out, in)
    b_in = bias_blk[:, 0:1]                          # (N, 1)
    if num_input <= 8:
        z = w_in[:, 0:1] * x[0:1, :]                 # (N,1)*(1,Bt) -> (N,Bt)
        for k in range(1, num_input):
            z = z + w_in[:, k:k + 1] * x[k:k + 1, :]
        z = z.astype(f32)
    else:
        z = jnp.dot(w_in, x, preferred_element_type=f32)
    h = jnp.tanh((z + b_in).astype(cd))              # (N, Bt)

    # ---- hidden layers: (num_layers - 1) x (Linear + Tanh), MXU f32 acc ----
    # TODO(synk): for very deep stacks switch this static unroll to
    # lax.fori_loop over pl.ds(RB*(1+l), N) to bound vreg live ranges.
    for l in range(H):
        r = RB * (1 + l)
        w = p_ref[r:r + N, 0:N]                      # (N, N)
        b = bias_blk[:, 1 + l:2 + l]                 # (N, 1)
        z = jnp.dot(w, h, preferred_element_type=f32)
        h = jnp.tanh((z + b).astype(cd))

    # ---- output layer: Linear (no activation), on the (idle) MXU -----------
    w_out = p_ref[r_wout:r_wout + num_output, 0:N]   # (num_output, N)
    b_out = bias_blk[0:num_output, L:L + 1]          # (num_output, 1)
    y = jnp.dot(w_out, h, preferred_element_type=f32)
    out_ref[...] = (y + b_out).astype(out_ref.dtype)


# ---------------------------------------------------------------------------
# Host-side parameter packing: one slab, one DMA.
# ---------------------------------------------------------------------------
def pack_beam_pinn_params(params, dtype=jnp.float32):
    """Pack all weights/biases into a single 2-D slab.

    Layout (row stride RB = round_up(N, 8), C = max(N, In, Out, L+1) columns):
      rows [0, N)                    : W_in  (N, In)      in cols [0, In)
      rows [RB*(1+l), +N), l < L-1   : W_hid[l] (N, N)    in cols [0, N)
      rows [RB*L, +Out)              : W_out (Out, N)     in cols [0, N)
      rows [RB*(L+1), +N)            : biases as columns: col 0 = b_in,
                                       col 1+l = b_hid[l], col L = b_out
    """
    w_in, b_in, w_hid, b_hid, w_out, b_out = params
    N, In = w_in.shape
    Out = w_out.shape[0]
    H = w_hid.shape[0]
    L = H + 1
    RB = _round_up(N, 8)
    C = max(N, In, Out, L + 1)
    R = RB * (L + 2)

    slab = jnp.zeros((R, C), dtype)
    slab = slab.at[0:N, 0:In].set(w_in.astype(dtype))
    for l in range(H):
        r = RB * (1 + l)
        slab = slab.at[r:r + N, 0:N].set(w_hid[l].astype(dtype))
    slab = slab.at[RB * L:RB * L + Out, 0:N].set(w_out.astype(dtype))
    rb = RB * (L + 1)
    slab = slab.at[rb:rb + N, 0:1].set(b_in.astype(dtype))
    for l in range(H):
        slab = slab.at[rb:rb + N, 1 + l:2 + l].set(b_hid[l].astype(dtype))
    slab = slab.at[rb:rb + Out, L:L + 1].set(b_out.astype(dtype))
    return slab, RB


# ---------------------------------------------------------------------------
# Wrapper: batch tiling / padding, BlockSpecs, pallas_call.
# ---------------------------------------------------------------------------
def beam_pinn_forward(x, params, *, batch_tile=2048, compute_dtype=jnp.float32,
                      min_grid_steps=1):
    """BeamPINN.forward: x (B, num_input) -> (B, num_output).

    Perf guidance:
      * The kernel is EUP-bound (tanh).  On v6e/v7x, compute_dtype=jnp.bfloat16
        roughly doubles tanh throughput; keep float32 whenever this forward
        feeds jax.grad/jvp (PINN losses), and on v5e (no bf16 VPU/EUP there --
        at most cast the matmul operands only).
      * min_grid_steps=2 on v7x keeps >=2 "parallel" grid steps so both
        TensorCores get work; leave 1 on single-TC v5e/v6e (the cap only
        shrinks tiles for no benefit there).
      * Call under jax.jit so the pad/transpose around the pallas_call is fused
        with it (or keep collocation points stored as (num_input, B) across the
        training loop to avoid the transpose entirely).
    """
    w_in, _, w_hid, _, w_out, _ = params
    B, num_input = x.shape
    num_output = w_out.shape[0]
    num_neurons = w_in.shape[0]
    num_layers = w_hid.shape[0] + 1

    # Single packed parameter slab: one constant-index DMA instead of ~7 tiny ones.
    slab, row_stride = pack_beam_pinn_params(params, compute_dtype)
    # TODO(synk): pipeline_mode=pl.Buffered(1) on the slab's BlockSpec would drop
    # its (tiny) second VMEM buffer; omitted for portability.

    # Batch tile: as large as the batch allows (per-grid-step overhead dominates
    # small tiles); only cap when we explicitly want >=min_grid_steps steps.
    bt = min(max(int(batch_tile), 128), _round_up(B, 128))
    bt = _round_up(bt, 128)
    if min_grid_steps > 1 and B > 128 * min_grid_steps:
        bt = min(bt, _round_up(pl.cdiv(B, min_grid_steps), 128))
    B_pad = _round_up(B, bt)

    if B_pad != B:
        x = jnp.pad(x, ((0, B_pad - B), (0, 0)))
    x_t = x.T                                   # features on sublanes, batch on lanes

    kernel = functools.partial(
        beam_pinn_kernel,
        num_layers=num_layers,
        num_neurons=num_neurons,
        num_input=num_input,
        num_output=num_output,
        row_stride=row_stride,
        compute_dtype=compute_dtype)

    out_t = pl.pallas_call(
        kernel,
        out_shape=jax.ShapeDtypeStruct((num_output, B_pad), x.dtype),
        grid_spec=pltpu.PrefetchScalarGridSpec(
            num_scalar_prefetch=0,
            grid=(B_pad // bt,),
            in_specs=[
                pl.BlockSpec((num_input, bt), lambda i: (0, i)),   # x tile
                pl.BlockSpec(slab.shape, lambda i: (0, 0)),        # packed params
            ],
            out_specs=pl.BlockSpec((num_output, bt), lambda i: (0, i)),
        ),
        compiler_params=pltpu.CompilerParams(
            dimension_semantics=("parallel",)),
    )(x_t, slab)

    return out_t.T[:B]                          # (B, num_output)


# ---------------------------------------------------------------------------
# Deterministic parameter init (xavier_normal weights, zero biases), matching
# BeamPINN.__init__ with PyTorch (out, in) weight orientation.
# ---------------------------------------------------------------------------
def init_beam_pinn_params(key, num_input, num_output, num_neurons, num_layers,
                          dtype=jnp.float32):
    def xavier_normal(key, fan_in, fan_out, shape):
        std = (2.0 / (fan_in + fan_out)) ** 0.5
        return (std * jax.random.normal(key, shape)).astype(dtype)

    n_hidden = num_layers - 1
    keys = jax.random.split(key, 2 + max(n_hidden, 1))

    w_in = xavier_normal(keys[0], num_input, num_neurons, (num_neurons, num_input))
    b_in = jnp.zeros((num_neurons, 1), dtype)
    if n_hidden > 0:
        w_hid = jnp.stack([xavier_normal(keys[2 + i], num_neurons, num_neurons,
                                         (num_neurons, num_neurons))
                           for i in range(n_hidden)])
        b_hid = jnp.zeros((n_hidden, num_neurons, 1), dtype)
    else:
        w_hid = jnp.zeros((0, num_neurons, num_neurons), dtype)
        b_hid = jnp.zeros((0, num_neurons, 1), dtype)
    w_out = xavier_normal(keys[1], num_neurons, num_output, (num_output, num_neurons))
    b_out = jnp.zeros((num_output, 1), dtype)
    return (w_in, b_in, w_hid, b_hid, w_out, b_out)


# Pure-JAX reference (same math, PyTorch orientation) for a sanity check.
def beam_pinn_reference(x, params):
    w_in, b_in, w_hid, b_hid, w_out, b_out = params
    hp = jax.lax.Precision.HIGHEST
    h = jnp.tanh(jnp.dot(x, w_in.T, precision=hp) + b_in[:, 0])
    for l in range(w_hid.shape[0]):
        h = jnp.tanh(jnp.dot(h, w_hid[l].T, precision=hp) + b_hid[l, :, 0])
    return jnp.dot(h, w_out.T, precision=hp) + b_out[:, 0]


if __name__ == "__main__":
    # PINN-style shapes: X is (batch, num_input=2) collocation points.
    num_input, num_output = 2, 1
    num_neurons, num_layers = 32, 4
    batch = 300                        # small, non-multiple of 128 -> exercises padding

    key = jax.random.PRNGKey(0)
    k_param, k_x = jax.random.split(key)

    params = init_beam_pinn_params(k_param, num_input, num_output,
                                   num_neurons, num_layers)
    x = jax.random.uniform(k_x, (batch, num_input), dtype=jnp.float32)

    fwd = jax.jit(functools.partial(beam_pinn_forward, batch_tile=1024))
    y = jax.block_until_ready(fwd(x, params))

    y_ref = beam_pinn_reference(x, params)
    assert y.shape == (batch, num_output)
    err = float(jnp.max(jnp.abs(y - y_ref)))
    assert jnp.allclose(y, y_ref, atol=1e-4, rtol=1e-4), err

    # TODO(synk): PDE_loss / boundary_loss / slope_data_loss / return_derivatives
    # are torch.autograd.grad compositions over this forward; in JAX they are
    # jax.grad / jax.jvp over beam_pinn_forward (f32), not separate Pallas kernels.
    print("KERNEL_OK")
</pallas_src>

<mosaic_0001>
module attributes {stable_mosaic.version = 11 : i64} {
  func.func @beam_pinn_kernel(%arg0: i32, %arg1: memref<2x384xf32, #tpu.memory_space<vmem>>, %arg2: memref<192x32xf32, #tpu.memory_space<vmem>>, %arg3: memref<1x384xf32, #tpu.memory_space<vmem>>) attributes {dimension_semantics = [#tpu.dimension_semantics<parallel>], iteration_bounds = array<i64: 1>, scalar_prefetch = 0 : i64, scratch_operands = 0 : i64, tpu.core_type = #tpu.core_type<tc>, window_params = [{transform_indices = @transform_0, window_bounds = array<i64: 2, 384>}, {pipeline_mode = #tpu.pipeline_mode<synchronous>, transform_indices = @transform_1, window_bounds = array<i64: 192, 32>}, {transform_indices = @transform_2, window_bounds = array<i64: 1, 384>}]} {
    %c0 = arith.constant 0 : index
    %c0_0 = arith.constant 0 : index
    %0 = vector.load %arg1[%c0, %c0_0] : memref<2x384xf32, #tpu.memory_space<vmem>>, vector<2x384xf32>
    %c160 = arith.constant 160 : index
    %c0_1 = arith.constant 0 : index
    %1 = vector.load %arg2[%c160, %c0_1] : memref<192x32xf32, #tpu.memory_space<vmem>>, vector<32x32xf32>
    %c0_2 = arith.constant 0 : index
    %c0_3 = arith.constant 0 : index
    %2 = vector.load %arg2[%c0_2, %c0_3] : memref<192x32xf32, #tpu.memory_space<vmem>>, vector<32x2xf32>
    %3 = vector.extract_strided_slice %1 {offsets = [0, 0], sizes = [32, 1], strides = [1, 1]} : vector<32x32xf32> to vector<32x1xf32>
    %4 = vector.extract_strided_slice %2 {offsets = [0, 0], sizes = [32, 1], strides = [1, 1]} : vector<32x2xf32> to vector<32x1xf32>
    %5 = vector.extract_strided_slice %0 {offsets = [0, 0], sizes = [1, 384], strides = [1, 1]} : vector<2x384xf32> to vector<1x384xf32>
    %6 = vector.broadcast %4 : vector<32x1xf32> to vector<32x384xf32>
    %7 = vector.broadcast %5 : vector<1x384xf32> to vector<32x384xf32>
    %8 = arith.mulf %6, %7 : vector<32x384xf32>
    %9 = vector.extract_strided_slice %2 {offsets = [0, 1], sizes = [32, 1], strides = [1, 1]} : vector<32x2xf32> to vector<32x1xf32>
    %10 = vector.extract_strided_slice %0 {offsets = [1, 0], sizes = [1, 384], strides = [1, 1]} : vector<2x384xf32> to vector<1x384xf32>
    %11 = vector.broadcast %9 : vector<32x1xf32> to vector<32x384xf32>
    %12 = vector.broadcast %10 : vector<1x384xf32> to vector<32x384xf32>
    %13 = arith.mulf %11, %12 : vector<32x384xf32>
    %14 = arith.addf %8, %13 : vector<32x384xf32>
    %15 = vector.broadcast %3 : vector<32x1xf32> to vector<32x384xf32>
    %16 = arith.addf %14, %15 : vector<32x384xf32>
    %17 = math.tanh %16 : vector<32x384xf32>
    %c32 = arith.constant 32 : index
    %c0_4 = arith.constant 0 : index
    %18 = vector.load %arg2[%c32, %c0_4] : memref<192x32xf32, #tpu.memory_space<vmem>>, vector<32x32xf32>
    %19 = vector.extract_strided_slice %1 {offsets = [0, 1], sizes = [32, 1], strides = [1, 1]} : vector<32x32xf32> to vector<32x1xf32>
    %cst = arith.constant dense<0.000000e+00> : vector<32x384xf32>
    %20 = tpu.matmul %18, %17, %cst {dimension_numbers = #tpu.dot_dimension_numbers<[1], [0], [0], [1], [0, 0, 1, 1], [], []>} : vector<32x32xf32>, vector<32x384xf32>, vector<32x384xf32> -> vector<32x384xf32>
    %21 = vector.broadcast %19 : vector<32x1xf32> to vector<32x384xf32>
    %22 = arith.addf %20, %21 : vector<32x384xf32>
    %23 = math.tanh %22 : vector<32x384xf32>
    %c64 = arith.constant 64 : index
    %c0_5 = arith.constant 0 : index
    %24 = vector.load %arg2[%c64, %c0_5] : memref<192x32xf32, #tpu.memory_space<vmem>>, vector<32x32xf32>
    %25 = vector.extract_strided_slice %1 {offsets = [0, 2], sizes = [32, 1], strides = [1, 1]} : vector<32x32xf32> to vector<32x1xf32>
    %cst_6 = arith.constant dense<0.000000e+00> : vector<32x384xf32>
    %26 = tpu.matmul %24, %23, %cst_6 {dimension_numbers = #tpu.dot_dimension_numbers<[1], [0], [0], [1], [0, 0, 1, 1], [], []>} : vector<32x32xf32>, vector<32x384xf32>, vector<32x384xf32> -> vector<32x384xf32>
    %27 = vector.broadcast %25 : vector<32x1xf32> to vector<32x384xf32>
    %28 = arith.addf %26, %27 : vector<32x384xf32>
    %29 = math.tanh %28 : vector<32x384xf32>
    %c96 = arith.constant 96 : index
    %c0_7 = arith.constant 0 : index
    %30 = vector.load %arg2[%c96, %c0_7] : memref<192x32xf32, #tpu.memory_space<vmem>>, vector<32x32xf32>
    %31 = vector.extract_strided_slice %1 {offsets = [0, 3], sizes = [32, 1], strides = [1, 1]} : vector<32x32xf32> to vector<32x1xf32>
    %cst_8 = arith.constant dense<0.000000e+00> : vector<32x384xf32>
    %32 = tpu.matmul %30, %29, %cst_8 {dimension_numbers = #tpu.dot_dimension_numbers<[1], [0], [0], [1], [0, 0, 1, 1], [], []>} : vector<32x32xf32>, vector<32x384xf32>, vector<32x384xf32> -> vector<32x384xf32>
    %33 = vector.broadcast %31 : vector<32x1xf32> to vector<32x384xf32>
    %34 = arith.addf %32, %33 : vector<32x384xf32>
    %35 = math.tanh %34 : vector<32x384xf32>
    %c128 = arith.constant 128 : index
    %c0_9 = arith.constant 0 : index
    %36 = vector.load %arg2[%c128, %c0_9] : memref<192x32xf32, #tpu.memory_space<vmem>>, vector<1x32xf32>
    %37 = vector.extract_strided_slice %1 {offsets = [0, 4], sizes = [1, 1], strides = [1, 1]} : vector<32x32xf32> to vector<1x1xf32>
    %cst_10 = arith.constant dense<0.000000e+00> : vector<1x384xf32>
    %38 = tpu.matmul %36, %35, %cst_10 {dimension_numbers = #tpu.dot_dimension_numbers<[1], [0], [0], [1], [0, 0, 1, 1], [], []>} : vector<1x32xf32>, vector<32x384xf32>, vector<1x384xf32> -> vector<1x384xf32>
    %39 = vector.broadcast %37 : vector<1x1xf32> to vector<1x384xf32>
    %40 = arith.addf %38, %39 : vector<1x384xf32>
    %c0_11 = arith.constant 0 : index
    %c0_12 = arith.constant 0 : index
    %41 = vector.load %arg3[%c0_11, %c0_12] : memref<1x384xf32, #tpu.memory_space<vmem>>, vector<1x384xf32>
    tpu.vector_store %arg3[%c0_11, %c0_12], %40 {strides = array<i32>} : memref<1x384xf32, #tpu.memory_space<vmem>>, vector<1x384xf32>,
    return
  }
  func.func @transform_0(%arg0: i32) -> (i32, i32) {
    %c0_i32 = arith.constant 0 : i32
    %c0_i32_0 = arith.constant 0 : i32
    return %c0_i32, %arg0 : i32, i32
  }
  func.func @transform_1(%arg0: i32) -> (i32, i32) {
    %c0_i32 = arith.constant 0 : i32
    %c0_i32_0 = arith.constant 0 : i32
    %c0_i32_1 = arith.constant 0 : i32
    return %c0_i32, %c0_i32_0 : i32, i32
  }
  func.func @transform_2(%arg0: i32) -> (i32, i32) {
    %c0_i32 = arith.constant 0 : i32
    %c0_i32_0 = arith.constant 0 : i32
    return %c0_i32, %arg0 : i32, i32
  }
}

</mosaic_0001>

<bundles_post_ra>
// kernel: beam_pinn_forward.1
= control target key start
LH: loop header
LB: loop body
LE: loop exit
PB: predicated region body
PF: predicated region fallthrough
CT: control target
= control target key end

     0   :  { %v1320_v0 = vmov 1   ;;  %v1321_v4 = vmov 0   ;;  %vm211_vm0 = vcmask 261120   ;;  %v1322_v11 = vmov 0.0   ;;  %s1501_s1 = inlined_call_operand.vmem [shape: f32[192,32], index: 1, kind: input, shape index: {}]   ;;  %s1502_s0 = inlined_call_operand.vmem [shape: f32[2,384], index: 0, kind: input, shape index: {}]   ;;  %s1503_s2 = inlined_call_operand.vmem [shape: f32[1,384], index: 2, kind: output, shape index: {}]  }
   0x1   :  { %1212 = vset.pattern.permute.xlu0 %v1320_v0  ;;  %1210 = vset.pattern.permute.xlu1 %v1320_v0  ;;  %v18_v1 = vld [vmem:[%s1501_s1 + $0x10] sm:$0xff]  ;;  %v16_v2 = vld [vmem:[%s1501_s1] sm:$0xff]  ;;  %v17_v3 = vld [vmem:[%s1501_s1 + $0x8] sm:$0xff]  ;;  %v41_v12 = vlaneseq  ;;  %vm1326_vm1 = vmmov 0  }
   0x2   :  { %89 = vperm.xlu0 %1212, %v18_v1   ;;  %81 = vperm.xlu1 %1210, %v16_v2   ;;  %v19_v5 = vld [vmem:[%s1501_s1 + $0x18] sm:$0xff]  ;;  %v1359_v6 = vld [vmem:[%s1501_s1 + $0xa8] sm:$0xff]  ;;  %v1364_v7 = vld [vmem:[%s1501_s1 + $0xa0] sm:$0xff] }
   0x3   :  { %v1371_v8 = vld [vmem:[%s1501_s1 + $0xb0] sm:$0xff]  ;;  %v1378_v9 = vld [vmem:[%s1501_s1 + $0xb8] sm:$0xff]  ;;  %v1387_v10 = vld [vmem:[%s1501_s1 + $0x20] sm:$0xff]  ;;  %288 = vmatprep.mubr.f32.mxu0 %v1322_v11  ;;  %v1393_v13 = vshrl.u32 %v41_v12, 7  ;;  %vm1024_vm2 = vcmp.lt.s32.totalorder %v41_v12, 384 }
   0x4   :  { %1094 = vmatprep.mubr.msk.f32.mxu1 %vm211_vm0, %v1387_v10  ;;  %v11_v22 = vld [vmem:[%s1502_s0] sm:$0x3f] }
   0x5   :  { %v43_v16 = vsub.s32 0, %v1393_v13  ;;  %v47_v17 = vsub.s32 2, %v1393_v13  ;;  %v51_v18 = vsub.s32 4, %v1393_v13  ;;  %v98_v19 = vsub.s32 1, %v1393_v13 }
   0x6   :  { %1213 = vset.pattern.permute.xlu0 %v1321_v4  ;;  %85 = vperm.xlu1 %1210, %v17_v3   ;;  %v102_v20 = vsub.s32 3, %v1393_v13  ;;  %v106_v21 = vsub.s32 5, %v1393_v13 }
   0x7   :  { %22 = vperm.xlu0 %1213, %v16_v2   ;;  %v44_v25 = vrot.slane %v11_v22, %v43_v16  ;;  %v48_v26 = vrot.slane %v11_v22, %v47_v17  ;;  %v52_v27 = vrot.slane %v11_v22, %v51_v18  ;;  %v99_v28 = vrot.slane %v11_v22, %v98_v19 }
   0x8   :  { %v103_v29 = vrot.slane %v11_v22, %v102_v20  ;;  %v107_v30 = vrot.slane %v11_v22, %v106_v21 }
   0x9   :  { %v59_v31 = vrot.slane %v44_v25, %v43_v16  ;;  %v63_v32 = vrot.slane %v48_v26, %v43_v16  ;;  %v67_v35 = vrot.slane %v52_v27, %v43_v16  ;;  %v114_v36 = vrot.slane %v99_v28, %v98_v19 }
   0xa   :  { %1211 = vset.pattern.permute.xlu1 %v1321_v4  ;;  %v118_v37 = vrot.slane %v103_v29, %v98_v19  ;;  %v122_v38 = vrot.slane %v107_v30, %v98_v19 }
   0xb   :  { %27 = vperm.xlu0 %1213, %v17_v3   ;;  %37 = vperm.xlu1 %1211, %v19_v5  }
   0xf   :  { %32 = vperm.xlu0 %1213, %v18_v1   ;;  %1214 = vset.pattern.permute.xlu1 %v1320_v0 }
  0x10   :  { %93 = vperm.xlu1 %1214, %v19_v5  }
  0x13   :  { %154 = vperm.xlu0 %1213, %v1359_v6  }
  0x14   :  { %1215 = vset.pattern.permute.xlu1 %v1321_v4 }
  0x15   :  { %149 = vperm.xlu1 %1215, %v1364_v7  }
  0x17   :  { %1216 = vset.pattern.permute.xlu0 %v1320_v0 }
  0x18   :  { %196 = vperm.xlu0 %1216, %v1364_v7  }
  0x19   :  { %159 = vperm.xlu1 %1215, %v1371_v8  }
  0x1c   :  { %208 = vperm.xlu0 %1216, %v1378_v9  }
  0x1d   :  { %164 = vperm.xlu1 %1215, %v1378_v9  }
  0x21   :  { %1217 = vset.pattern.permute.xlu1 %v1320_v0 }
  0x22   :  { %200 = vperm.xlu1 %1217, %v1359_v6  }
  0x26   :  { %204 = vperm.xlu1 %1217, %v1371_v8  }
  0x81   :  { %v82_v14 = vpop.permute.xlu1 %81  ;;  %v90_v15 = vpop.permute.xlu0 %89 }
  0x82   :  { %v123_v49 = vmul.f32 %v114_v36, %v82_v14  ;;  %v124_v50 = vmul.f32 %v118_v37, %v82_v14  ;;  %v125_v55 = vmul.f32 %v122_v38, %v82_v14  ;;  %v129_v0 = vmul.f32 %v114_v36, %v90_v15 }
  0x83   :  { %v130_v1 = vmul.f32 %v118_v37, %v90_v15  ;;  %v131_v5 = vmul.f32 %v122_v38, %v90_v15 }
  0x85   :  { %v86_v23 = vpop.permute.xlu1 %85 }
  0x86   :  { %v23_v24 = vpop.permute.xlu0 %22  ;;  %v126_v45 = vmul.f32 %v114_v36, %v86_v23  ;;  %v127_v46 = vmul.f32 %v118_v37, %v86_v23  ;;  %v128_v47 = vmul.f32 %v122_v38, %v86_v23 }
  0x87   :  { %v68_v42 = vmul.f32 %v59_v31, %v23_v24  ;;  %v69_v43 = vmul.f32 %v63_v32, %v23_v24  ;;  %v70_v51 = vmul.f32 %v67_v35, %v23_v24 }
  0x89   :  { %v135_v58 = vadd.f32 %v123_v49, %v68_v42  ;;  %v136_v59 = vadd.f32 %v124_v50, %v69_v43  ;;  %v137_v4 = vadd.f32 %v125_v55, %v70_v51  ;;  %v192_v55 = vld [vmem:[%s1501_s1 + $0x28] sm:$0xff] }
  0x8a   :  { %v28_v33 = vpop.permute.xlu0 %27  ;;  %v38_v34 = vpop.permute.xlu1 %37 }
  0x8b   :  { %v71_v39 = vmul.f32 %v59_v31, %v28_v33  ;;  %v72_v40 = vmul.f32 %v63_v32, %v28_v33  ;;  %v73_v41 = vmul.f32 %v67_v35, %v28_v33  ;;  %v77_v23 = vmul.f32 %v59_v31, %v38_v34 }
  0x8c   :  { %v78_v24 = vmul.f32 %v63_v32, %v38_v34  ;;  %v79_v27 = vmul.f32 %v67_v35, %v38_v34 }
  0x8d   :  { %v138_v52 = vadd.f32 %v126_v45, %v71_v39  ;;  %v139_v53 = vadd.f32 %v127_v46, %v72_v40  ;;  %v140_v54 = vadd.f32 %v128_v47, %v73_v41 }
  0x8e   :  { %v33_v44 = vpop.permute.xlu0 %32 }
  0x8f   :  { %v94_v48 = vpop.permute.xlu1 %93  ;;  %v74_v56 = vmul.f32 %v59_v31, %v33_v44  ;;  %v75_v60 = vmul.f32 %v63_v32, %v33_v44  ;;  %v76_v2 = vmul.f32 %v67_v35, %v33_v44 }
  0x90   :  { %v132_v18 = vmul.f32 %v114_v36, %v94_v48  ;;  %v133_v19 = vmul.f32 %v118_v37, %v94_v48  ;;  %v134_v20 = vmul.f32 %v122_v38, %v94_v48 }
  0x91   :  { %v141_v21 = vadd.f32 %v129_v0, %v74_v56  ;;  %v142_v22 = vadd.f32 %v130_v1, %v75_v60  ;;  %v143_v26 = vadd.f32 %v131_v5, %v76_v2  ;;  %v193_v56 = vld [vmem:[%s1501_s1 + $0x30] sm:$0xff] }
  0x92   :  { %v155_v57 = vpop.permute.xlu0 %154  ;;  %v144_v30 = vadd.f32 %v132_v18, %v77_v23  ;;  %v145_v33 = vadd.f32 %v133_v19, %v78_v24  ;;  %v146_v36 = vadd.f32 %v134_v20, %v79_v27 }
  0x93   :  { %v170_v61 = vadd.f32 %v155_v57, %v138_v52  ;;  %v171_v62 = vadd.f32 %v155_v57, %v139_v53  ;;  %v172_v63 = vadd.f32 %v155_v57, %v140_v54  ;;  %v194_v57 = vld [vmem:[%s1501_s1 + $0x38] sm:$0xff] }
  0x94   :  { %v150_v3 = vpop.permute.xlu1 %149 }
  0x95   :  { %1224 = vtanh.f32 %v170_v61  ;;  %v167_v16 = vadd.f32 %v150_v3, %v135_v58  ;;  %v168_v17 = vadd.f32 %v150_v3, %v136_v59  ;;  %v169_v14 = vadd.f32 %v150_v3, %v137_v4 }
  0x96   :  { %1226 = vtanh.f32 %v171_v62  ;;  %v1323_v58 = vmov 2  }
  0x97   :  { %1228 = vtanh.f32 %v172_v63  ;;  %1218 = vset.pattern.permute.xlu1 %v1323_v58  ;;  %1219 = vset.pattern.permute.xlu0 %v1323_v58  ;;  %v197_v59 = vpop.permute.xlu0 %196 }
  0x98   :  { %1230 = vtanh.f32 %v167_v16  ;;  %v160_v25 = vpop.permute.xlu1 %159  ;;  %415 = vperm.xlu1 %1218, %v1364_v7   ;;  %419 = vperm.xlu0 %1219, %v1359_v6  }
  0x99   :  { %1232 = vtanh.f32 %v168_v17  ;;  %v173_v28 = vadd.f32 %v160_v25, %v141_v21  ;;  %v174_v15 = vadd.f32 %v160_v25, %v142_v22  ;;  %v175_v29 = vadd.f32 %v160_v25, %v143_v26 }
  0x9a   :  { %1234 = vtanh.f32 %v169_v14 }
  0x9b   :  { %1236 = vtanh.f32 %v173_v28  ;;  %v209_v5 = vpop.permute.xlu0 %208 }
  0x9c   :  { %v165_v37 = vpop.permute.xlu1 %164  ;;  %1238 = vtanh.f32 %v174_v15  ;;  %423 = vperm.xlu1 %1218, %v1371_v8  }
  0x9d   :  { %v176_v38 = vadd.f32 %v165_v37, %v144_v30  ;;  %v177_v39 = vadd.f32 %v165_v37, %v145_v33  ;;  %v178_v40 = vadd.f32 %v165_v37, %v146_v36  ;;  %1240 = vtanh.f32 %v175_v29 }
  0x9f   :  { %v1225_v31 = vpop.eup %1224  ;;  %1242 = vtanh.f32 %v176_v38 }
  0xa0   :  { %v1227_v32 = vpop.eup %1226  ;;  %1244 = vtanh.f32 %v177_v39  ;;  %427 = vperm.xlu1 %1218, %v1378_v9  }
  0xa1   :  { %v1229_v34 = vpop.eup %1228  ;;  %1246 = vtanh.f32 %v178_v40  ;;  %v201_v60 = vpop.permute.xlu1 %200 }
  0xa2   :  { %v1231_v35 = vpop.eup %1230 }
  0xa3   :  { %v1233_v41 = vpop.eup %1232  ;;  %v1141_v42 = vpack.c.bf16 %v1225_v31, %v1231_v35 }
  0xa4   :  { %v1235_v43 = vpop.eup %1234  ;;  %v1139_v44 = vpack.c.bf16 %v1227_v32, %v1233_v41 }
  0xa5   :  { %v1147_v45 = vpack.c.bf16 %v1229_v34, %v1235_v43  ;;  %v1237_v46 = vpop.eup %1236  ;;  %v205_v17 = vpop.permute.xlu1 %204 }
  0xa6   :  { %1140 = vmatprep.subr.bf16.mxu0 %v1139_v44  ;;  %v1239_v47 = vpop.eup %1238 }
  0xa7   :  { %1148 = vmatprep.subr.bf16.mxu1 %v1147_v45  ;;  %1142 = vmatpush1.bf16.msra.mxu0 %v1141_v42  ;;  %v1241_v48 = vpop.eup %1240 }
  0xa8   :  { %1150 = vmatpush3.bf16.msra.mxu1 %v1147_v45  ;;  %v411_v45 = vld [vmem:[%s1501_s1 + $0x48] sm:$0xff] }
  0xa9   :  { %v1243_v49 = vpop.eup %1242 }
  0xaa   :  { %v1245_v50 = vpop.eup %1244  ;;  %v1145_v51 = vpack.c.bf16 %v1243_v49, %v1237_v46 }
  0xab   :  { %v1247_v52 = vpop.eup %1246  ;;  %v1143_v53 = vpack.c.bf16 %v1245_v50, %v1239_v47  ;;  %v412_v47 = vld [vmem:[%s1501_s1 + $0x50] sm:$0xff] }
  0xac   :  { %v1151_v54 = vpack.c.bf16 %v1247_v52, %v1241_v48  ;;  %v1460_v52 = vld [vmem:[%s1501_s1 + $0x60] sm:$0xff] }
  0xad   :  { %1144 = vmatprep.subr.bf16.mxu0 %v1143_v53  ;;  %v1324_v53 = vmov 3  }
  0xae   :  { %1152 = vmatprep.subr.bf16.mxu1 %v1151_v54  ;;  %1146 = vmatpush1.bf16.msra.mxu0 %v1145_v51  ;;  %v413_v51 = vld [vmem:[%s1501_s1 + $0x58] sm:$0xff] }
  0xaf   :  { %1154 = vmatpush3.bf16.msra.mxu1 %v1151_v54  ;;  %1220 = vset.pattern.permute.xlu0 %v1324_v53 }
  0xb0   :  { %1221 = vset.pattern.permute.xlu1 %v1324_v53  ;;  %633 = vperm.xlu0 %1220, %v1364_v7  }
  0xb1   :  { %1031 = vmatmul.mubr.msk.f32.vlgmr.msra.gmra.mrb[0].mxu0 %vm211_vm0, %v1387_v10  ;;  %v1428_v10 = vld [vmem:[%s1501_s1 + $0x40] sm:$0xff]  ;;  %637 = vperm.xlu1 %1221, %v1359_v6  }
  0xb2   :  { %294 = vmatprep.mubr.f32.mxu0 %v1322_v11  ;;  %1095 = vmatmul.mubr.msk.f32.vlgmr.msra.gmra.mrb[0].mxu1 %vm211_vm0, %v192_v55 }
  0xb3   :  { %1097 = vmatprep.mubr.msk.f32.mxu1 %vm211_vm0, %v193_v56 }
  0xb4   :  { %645 = vperm.xlu0 %1220, %v1378_v9  }
  0xb5   :  { %1032 = vmatmul.mubr.msk.f32.gmra.mrb[2].mxu0 %vm211_vm0, %v192_v55  ;;  %641 = vperm.xlu1 %1221, %v1371_v8  }
  0xb6   :  { %300 = vmatprep.mubr.f32.mxu0 %v1322_v11  ;;  %1098 = vmatmul.mubr.msk.f32.gmra.mrb[2].mxu1 %vm211_vm0, %v194_v57 }
  0xb7   :  { %506 = vmatprep.mubr.f32.mxu1 %v1322_v11 }
  0xb9   :  { %1033 = vmatmul.mubr.msk.f32.gmra.mrb[4].mxu0 %vm211_vm0, %v193_v56 }
  0xba   :  { %306 = vmatprep.mubr.f32.mxu0 %v1322_v11 }
  0xbd   :  { %1034 = vmatmul.mubr.msk.f32.gmra.mrb[6].mxu0 %vm211_vm0, %v194_v57 }
  0xbe   :  { %1108 = vmatprep.mubr.msk.f32.mxu0 %vm211_vm0, %v1428_v10 }
 0x117   :  { %v416_v54 = vpop.permute.xlu1 %415  ;;  %v420_v56 = vpop.permute.xlu0 %419 }
 0x11b   :  { %v424_v55 = vpop.permute.xlu1 %423 }
 0x184   :  { %v290_v61 = vpop.f32.mrb[0].mxu0 }
 0x185   :  { %v291_v62 = vadd.f32 %v290_v61, %v197_v59  ;;  %v292_v63 = vpop.f32.mrb[1].mxu0  ;;  %v1096_v0 = vpop.f32.mrb[0].mxu1 }
 0x186   :  { %v293_v1 = vadd.f32 %v292_v63, %v197_v59  ;;  %v385_v2 = vadd.f32 %v1096_v0, %v201_v60  ;;  %v379_v3 = vpop.f32.mrb[1].mxu1 }
 0x187   :  { %1248 = vtanh.f32 %v291_v62  ;;  %v380_v4 = vadd.f32 %v379_v3, %v197_v59 }
 0x188   :  { %1250 = vtanh.f32 %v293_v1  ;;  %v296_v16 = vpop.f32.mrb[2].mxu0 }
 0x189   :  { %1252 = vtanh.f32 %v385_v2  ;;  %v297_v18 = vadd.f32 %v296_v16, %v201_v60  ;;  %v298_v19 = vpop.f32.mrb[3].mxu0  ;;  %v1099_v14 = vpop.f32.mrb[2].mxu1 }
 0x18a   :  { %1254 = vtanh.f32 %v380_v4  ;;  %v299_v20 = vadd.f32 %v298_v19, %v201_v60  ;;  %v395_v21 = vadd.f32 %v1099_v14, %v209_v5  ;;  %v389_v22 = vpop.f32.mrb[3].mxu1  ;;  %v428_v60 = vpop.permute.xlu1 %427 }
 0x18b   :  { %1256 = vtanh.f32 %v297_v18  ;;  %v390_v23 = vadd.f32 %v389_v22, %v205_v17 }
 0x18c   :  { %1258 = vtanh.f32 %v299_v20  ;;  %v302_v24 = vpop.f32.mrb[4].mxu0 }
 0x18d   :  { %1260 = vtanh.f32 %v395_v21  ;;  %v303_v25 = vadd.f32 %v302_v24, %v205_v17  ;;  %v304_v26 = vpop.f32.mrb[5].mxu0 }
 0x18e   :  { %1262 = vtanh.f32 %v390_v23  ;;  %v305_v27 = vadd.f32 %v304_v26, %v205_v17 }
 0x18f   :  { %1264 = vtanh.f32 %v303_v25 }
 0x190   :  { %v308_v28 = vpop.f32.mrb[6].mxu0  ;;  %1266 = vtanh.f32 %v305_v27 }
 0x191   :  { %v1249_v15 = vpop.eup %1248  ;;  %v309_v29 = vadd.f32 %v308_v28, %v209_v5  ;;  %v310_v30 = vpop.f32.mrb[7].mxu0 }
 0x192   :  { %v1251_v33 = vpop.eup %1250  ;;  %v311_v36 = vadd.f32 %v310_v30, %v209_v5  ;;  %v629_v30 = vld [vmem:[%s1501_s1 + $0x68] sm:$0xff] }
 0x193   :  { %v1253_v37 = vpop.eup %1252  ;;  %1268 = vtanh.f32 %v309_v29 }
 0x194   :  { %v1255_v38 = vpop.eup %1254  ;;  %1270 = vtanh.f32 %v311_v36  ;;  %v630_v36 = vld [vmem:[%s1501_s1 + $0x70] sm:$0xff] }
 0x195   :  { %v1257_v39 = vpop.eup %1256  ;;  %v1163_v40 = vpack.c.bf16 %v1253_v37, %v1255_v38 }
 0x196   :  { %v1259_v31 = vpop.eup %1258  ;;  %v1157_v32 = vpack.c.bf16 %v1257_v39, %v1249_v15 }
 0x197   :  { %v1261_v34 = vpop.eup %1260  ;;  %1164 = vmatprep.subr.bf16.mxu0 %v1163_v40  ;;  %v1155_v35 = vpack.c.bf16 %v1259_v31, %v1251_v33 }
 0x198   :  { %v1263_v41 = vpop.eup %1262  ;;  %1166 = vmatpush3.bf16.msra.mxu0 %v1163_v40  ;;  %v631_v40 = vld [vmem:[%s1501_s1 + $0x78] sm:$0xff] }
 0x199   :  { %1156 = vmatprep.subr.bf16.mxu1 %v1155_v35  ;;  %v1167_v42 = vpack.c.bf16 %v1261_v34, %v1263_v41  ;;  %v1265_v43 = vpop.eup %1264 }
 0x19a   :  { %1158 = vmatpush1.bf16.msra.mxu1 %v1157_v32  ;;  %v1267_v44 = vpop.eup %1266 }
 0x19b   :  { %1168 = vmatprep.subr.bf16.mxu0 %v1167_v42 }
 0x19c   :  { %1170 = vmatpush3.bf16.msra.mxu0 %v1167_v42 }
 0x19d   :  { %v1269_v46 = vpop.eup %1268 }
 0x19e   :  { %v1271_v48 = vpop.eup %1270  ;;  %v1161_v49 = vpack.c.bf16 %v1269_v46, %v1265_v43  ;;  %v1325_v43 = vmov 0.0|0.0   ;;  %v634_v46 = vpop.permute.xlu0 %633 }
 0x19f   :  { %v1159_v50 = vpack.c.bf16 %v1271_v48, %v1267_v44  ;;  %1109 = vmatmul.mubr.msk.f32.vlgmr.msra.gmra.mrb[8].mxu0 %vm211_vm0, %v411_v45  ;;  %v1327_v44 = vmov 4  }
 0x1a0   :  { %1111 = vmatprep.mubr.msk.f32.mxu0 %vm211_vm0, %v412_v47  ;;  %1222 = vset.pattern.permute.xlu1 %v1327_v44 }
 0x1a1   :  { %1160 = vmatprep.subr.bf16.mxu1 %v1159_v50  ;;  %848 = vperm.xlu1 %1222, %v1364_v7  }
 0x1a2   :  { %1162 = vmatpush1.bf16.msra.mxu1 %v1161_v49  ;;  %1223 = vset.pattern.permute.xlu0 %v1327_v44 }
 0x1a3   :  { %1112 = vmatmul.mubr.msk.f32.gmra.mrb[10].mxu0 %vm211_vm0, %v413_v51 }
 0x1a4   :  { %724 = vmatprep.mubr.f32.mxu0 %v1322_v11 }
 0x1a5   :  { %1039 = vmatmul.mubr.msk.f32.vlgmr.msra.gmra.mrb[4].mxu1 %vm211_vm0, %v1428_v10 }
 0x1a6   :  { %512 = vmatprep.mubr.f32.mxu1 %v1322_v11 }
 0x1a9   :  { %1040 = vmatmul.mubr.msk.f32.gmra.mrb[6].mxu1 %vm211_vm0, %v411_v45  ;;  %v638_v45 = vpop.permute.xlu1 %637 }
 0x1aa   :  { %518 = vmatprep.mubr.f32.mxu1 %v1322_v11 }
 0x1ad   :  { %1041 = vmatmul.mubr.msk.f32.gmra.mrb[8].mxu1 %vm211_vm0, %v412_v47 }
 0x1ae   :  { %524 = vmatprep.mubr.f32.mxu1 %v1322_v11 }
 0x1b1   :  { %1042 = vmatmul.mubr.msk.f32.gmra.mrb[10].mxu1 %vm211_vm0, %v413_v51  ;;  %v646_v51 = vpop.permute.xlu0 %645 }
 0x1b2   :  { %1122 = vmatprep.mubr.msk.f32.mxu1 %vm211_vm0, %v1460_v52 }
 0x272   :  { %v1110_v57 = vpop.f32.mrb[8].mxu0 }
 0x273   :  { %v603_v10 = vadd.f32 %v1110_v57, %v420_v56  ;;  %v597_v58 = vpop.f32.mrb[9].mxu0 }
 0x274   :  { %v598_v59 = vadd.f32 %v597_v58, %v416_v54 }
 0x275   :  { %1272 = vtanh.f32 %v603_v10 }
 0x276   :  { %1274 = vtanh.f32 %v598_v59  ;;  %v1113_v61 = vpop.f32.mrb[10].mxu0 }
 0x277   :  { %v613_v62 = vadd.f32 %v1113_v61, %v428_v60  ;;  %v607_v63 = vpop.f32.mrb[11].mxu0 }
 0x278   :  { %v508_v0 = vpop.f32.mrb[4].mxu1  ;;  %v608_v1 = vadd.f32 %v607_v63, %v424_v55 }
 0x279   :  { %v509_v6 = vadd.f32 %v508_v0, %v416_v54  ;;  %v510_v2 = vpop.f32.mrb[5].mxu1  ;;  %1276 = vtanh.f32 %v613_v62 }
 0x27a   :  { %v511_v9 = vadd.f32 %v510_v2, %v416_v54  ;;  %1278 = vtanh.f32 %v608_v1 }
 0x27b   :  { %1280 = vtanh.f32 %v509_v6 }
 0x27c   :  { %v514_v8 = vpop.f32.mrb[6].mxu1  ;;  %1282 = vtanh.f32 %v511_v9  ;;  %v846_v9 = vld [vmem:[%s1501_s1 + $0x80] sm:$0x1] }
 0x27d   :  { %v515_v3 = vadd.f32 %v514_v8, %v420_v56  ;;  %v516_v4 = vpop.f32.mrb[7].mxu1 }
 0x27e   :  { %v517_v5 = vadd.f32 %v516_v4, %v420_v56 }
 0x27f   :  { %v1273_v16 = vpop.eup %1272  ;;  %1284 = vtanh.f32 %v515_v3 }
 0x280   :  { %v1275_v17 = vpop.eup %1274  ;;  %1286 = vtanh.f32 %v517_v5  ;;  %v520_v18 = vpop.f32.mrb[8].mxu1 }
 0x281   :  { %v521_v19 = vadd.f32 %v520_v18, %v424_v55  ;;  %v522_v14 = vpop.f32.mrb[9].mxu1  ;;  %v1179_v20 = vpack.c.bf16 %v1273_v16, %v1275_v17 }
 0x282   :  { %v523_v21 = vadd.f32 %v522_v14, %v424_v55 }
 0x283   :  { %v1277_v22 = vpop.eup %1276  ;;  %1180 = vmatprep.subr.bf16.mxu1 %v1179_v20  ;;  %1288 = vtanh.f32 %v521_v19 }
 0x284   :  { %v1279_v23 = vpop.eup %1278  ;;  %v526_v24 = vpop.f32.mrb[10].mxu1  ;;  %1182 = vmatpush3.bf16.msra.mxu1 %v1179_v20  ;;  %1290 = vtanh.f32 %v523_v21 }
 0x285   :  { %v527_v25 = vadd.f32 %v526_v24, %v428_v60  ;;  %v528_v26 = vpop.f32.mrb[11].mxu1  ;;  %v1183_v27 = vpack.c.bf16 %v1277_v22, %v1279_v23  ;;  %v1281_v15 = vpop.eup %1280 }
 0x286   :  { %v529_v28 = vadd.f32 %v528_v26, %v428_v60  ;;  %v1283_v29 = vpop.eup %1282 }
 0x287   :  { %1292 = vtanh.f32 %v527_v25  ;;  %1184 = vmatprep.subr.bf16.mxu1 %v1183_v27 }
 0x288   :  { %1294 = vtanh.f32 %v529_v28  ;;  %1186 = vmatpush3.bf16.msra.mxu1 %v1183_v27 }
 0x289   :  { %v1285_v33 = vpop.eup %1284 }
 0x28a   :  { %v1287_v37 = vpop.eup %1286  ;;  %v1173_v38 = vpack.c.bf16 %v1285_v33, %v1281_v15 }
 0x28b   :  { %v1171_v39 = vpack.c.bf16 %v1287_v37, %v1283_v29  ;;  %1123 = vmatmul.mubr.msk.f32.vlgmr.msra.gmra.mrb[12].mxu1 %vm211_vm0, %v629_v30 }
 0x28c   :  { %1125 = vmatprep.mubr.msk.f32.mxu1 %vm211_vm0, %v630_v36 }
 0x28d   :  { %1172 = vmatprep.subr.bf16.mxu0 %v1171_v39  ;;  %v1289_v31 = vpop.eup %1288 }
 0x28e   :  { %1174 = vmatpush1.bf16.msra.mxu0 %v1173_v38  ;;  %v1291_v32 = vpop.eup %1290 }
 0x28f   :  { %1126 = vmatmul.mubr.msk.f32.gmra.mrb[14].mxu1 %vm211_vm0, %v631_v40 }
 0x290   :  { %918 = vmatprep.mubr.f32.mxu1 %v1322_v11 }
 0x291   :  { %v1293_v34 = vpop.eup %1292 }
 0x292   :  { %v1295_v35 = vpop.eup %1294  ;;  %v1177_v41 = vpack.c.bf16 %v1293_v34, %v1289_v31 }
 0x293   :  { %v1175_v42 = vpack.c.bf16 %v1295_v35, %v1291_v32 }
 0x295   :  { %1176 = vmatprep.subr.bf16.mxu0 %v1175_v42 }
 0x296   :  { %1178 = vmatpush1.bf16.msra.mxu0 %v1177_v41 }
 0x297   :  { %1195 = vmatprep.subr.bf16.mxu0 %v1325_v43 }
 0x299   :  { %1047 = vmatmul.mubr.msk.f32.vlgmr.msra.gmra.mrb[12].mxu0 %vm211_vm0, %v1460_v52  ;;  %v642_v52 = vpop.permute.xlu1 %641 }
 0x29a   :  { %730 = vmatprep.mubr.f32.mxu0 %v1322_v11 }
 0x29d   :  { %1048 = vmatmul.mubr.msk.f32.gmra.mrb[14].mxu0 %vm211_vm0, %v629_v30  ;;  %v849_v38 = vpop.permute.xlu1 %848 }
 0x29e   :  { %736 = vmatprep.mubr.f32.mxu0 %v1322_v11 }
 0x2a1   :  { %1049 = vmatmul.mubr.msk.f32.gmra.mrb[16].mxu0 %vm211_vm0, %v630_v36  ;;  %v1328_v36 = vmov 1966171168  }
 0x2a2   :  { %742 = vmatprep.mubr.f32.mxu0 %v1322_v11  ;;  %v1000_v37 = vunpack.c.l.s4 %v1328_v36 }
 0x2a4   :  { %v1001_v39 = vunpack.c.0.s8 %v1000_v37 }
 0x2a5   :  { %1050 = vmatmul.mubr.msk.f32.gmra.mrb[18].mxu0 %vm211_vm0, %v631_v40 }
 0x2a6   :  { %1136 = vmatprep.mubr.msk.f32.mxu0 %vm1326_vm1, %v1322_v11  ;;  %v1004_v35 = vsub.s32 %v1001_v39, %v1393_v13 }
 0x35e   :  { %v1124_v47 = vpop.f32.mrb[12].mxu1 }
 0x35f   :  { %v821_v48 = vadd.f32 %v1124_v47, %v638_v45  ;;  %v815_v49 = vpop.f32.mrb[13].mxu1 }
 0x360   :  { %v816_v50 = vadd.f32 %v815_v49, %v634_v46 }
 0x361   :  { %1296 = vtanh.f32 %v821_v48 }
 0x362   :  { %1298 = vtanh.f32 %v816_v50  ;;  %v1127_v53 = vpop.f32.mrb[14].mxu1 }
 0x363   :  { %v831_v54 = vadd.f32 %v1127_v53, %v646_v51  ;;  %v825_v55 = vpop.f32.mrb[15].mxu1 }
 0x364   :  { %v826_v56 = vadd.f32 %v825_v55, %v642_v52 }
 0x365   :  { %1300 = vtanh.f32 %v831_v54 }
 0x366   :  { %1302 = vtanh.f32 %v826_v56 }
 0x36b   :  { %v1297_v11 = vpop.eup %1296 }
 0x36c   :  { %v1299_v57 = vpop.eup %1298  ;;  %v726_v7 = vpop.f32.mrb[12].mxu0 }
 0x36d   :  { %v727_v10 = vadd.f32 %v726_v7, %v634_v46  ;;  %v728_v58 = vpop.f32.mrb[13].mxu0  ;;  %v1196_v59 = vpack.c.bf16 %v1297_v11, %v1299_v57 }
 0x36e   :  { %v729_v60 = vadd.f32 %v728_v58, %v634_v46 }
 0x36f   :  { %v1301_v61 = vpop.eup %1300  ;;  %1197 = vmatpush3.bf16.msra.mxu0 %v1196_v59  ;;  %1304 = vtanh.f32 %v727_v10 }
 0x370   :  { %v1303_v62 = vpop.eup %1302  ;;  %v732_v63 = vpop.f32.mrb[14].mxu0  ;;  %1198 = vmatprep.subr.bf16.mxu0 %v1325_v43  ;;  %1306 = vtanh.f32 %v729_v60 }
 0x371   :  { %v733_v0 = vadd.f32 %v732_v63, %v638_v45  ;;  %v734_v1 = vpop.f32.mrb[15].mxu0  ;;  %v1199_v6 = vpack.c.bf16 %v1301_v61, %v1303_v62 }
 0x372   :  { %v735_v2 = vadd.f32 %v734_v1, %v638_v45 }
 0x373   :  { %1308 = vtanh.f32 %v733_v0  ;;  %1200 = vmatpush3.bf16.msra.mxu0 %v1199_v6 }
 0x374   :  { %1310 = vtanh.f32 %v735_v2  ;;  %v738_v8 = vpop.f32.mrb[16].mxu0 }
 0x375   :  { %v739_v3 = vadd.f32 %v738_v8, %v642_v52  ;;  %v740_v4 = vpop.f32.mrb[17].mxu0 }
 0x376   :  { %v741_v5 = vadd.f32 %v740_v4, %v642_v52  ;;  %1137 = vmatmul.mubr.msk.f32.vlgmr.msra.gmra.mrb[20].mxu0 %vm211_vm0, %v846_v9 }
 0x377   :  { %1312 = vtanh.f32 %v739_v3 }
 0x378   :  { %v744_v16 = vpop.f32.mrb[18].mxu0  ;;  %1314 = vtanh.f32 %v741_v5 }
 0x379   :  { %v745_v17 = vadd.f32 %v744_v16, %v646_v51  ;;  %v746_v18 = vpop.f32.mrb[19].mxu0  ;;  %v1305_v14 = vpop.eup %1304 }
 0x37a   :  { %v747_v19 = vadd.f32 %v746_v18, %v646_v51  ;;  %v1307_v20 = vpop.eup %1306 }
 0x37b   :  { %1316 = vtanh.f32 %v745_v17 }
 0x37c   :  { %1318 = vtanh.f32 %v747_v19 }
 0x37d   :  { %v1309_v21 = vpop.eup %1308 }
 0x37e   :  { %v1311_v22 = vpop.eup %1310  ;;  %v1189_v23 = vpack.c.bf16 %v1309_v21, %v1305_v14 }
 0x37f   :  { %v1187_v24 = vpack.c.bf16 %v1311_v22, %v1307_v20 }
 0x381   :  { %1188 = vmatprep.subr.bf16.mxu1 %v1187_v24  ;;  %v1313_v25 = vpop.eup %1312 }
 0x382   :  { %1190 = vmatpush1.bf16.msra.mxu1 %v1189_v23  ;;  %v1315_v26 = vpop.eup %1314 }
 0x385   :  { %v1317_v27 = vpop.eup %1316 }
 0x386   :  { %v1319_v28 = vpop.eup %1318  ;;  %v1193_v15 = vpack.c.bf16 %v1317_v27, %v1313_v25 }
 0x387   :  { %v1191_v29 = vpack.c.bf16 %v1319_v28, %v1315_v26 }
 0x389   :  { %1192 = vmatprep.subr.bf16.mxu1 %v1191_v29 }
 0x38a   :  { %1194 = vmatpush1.bf16.msra.mxu1 %v1193_v15 }
 0x38d   :  { %1055 = vmatmul.mubr.msk.f32.vlgmr.msra.gmra.mrb[16].mxu1 %vm211_vm0, %v846_v9 }
 0x449   :  { %v991_v30 = vpop.f32.mrb[20].mxu0 }
 0x44a   :  { %v1138_v33 = vpop.f32.mrb[21].mxu0  ;;  %v992_v41 = vadd.f32 %v991_v30, %v849_v38 }
 0x44c   :  { %v1012_v44 = vrot.slane %v992_v41, %v1004_v35 }
 0x460   :  { %v920_v40 = vpop.f32.mrb[16].mxu1 }
 0x461   :  { %v921_v31 = vadd.f32 %v920_v40, %v849_v38  ;;  %v922_v32 = vpop.f32.mrb[17].mxu1 }
 0x462   :  { %v923_v34 = vadd.f32 %v922_v32, %v849_v38 }
 0x464   :  { %v998_v42 = vcombine.low %v921_v31, %v923_v34 }
 0x466   :  { %v1005_v43 = vrot.slane %v998_v42, %v1004_v35 }
 0x468   :  { %v1013_v45 = vcombine.low %v1005_v43, %v1012_v44 }
 0x46a   :  { %v1020_v46 = vrot.slane %v1013_v45, %v1004_v35 }
 0x46c   :  { %1026 = vst.msk [vmem:[%s1503_s2] sm:$0x7] %vm1024_vm2, %v1020_v46 }

</bundles_post_ra>
